<compile_context>
chip_gen: v7x
topology: tpu7x:2x2x1
jax: 0.10.0
libtpu: 0.0.40
codegen_flags: <defaults>
</compile_context>

<pallas_src>
import functools
import math

import jax
import jax.numpy as jnp
from jax import lax
from jax.experimental import pallas as pl
from jax.experimental.pallas import tpu as pltpu

_NEG_INF = -1e30        # init value for the running max
_PAD_BIAS = -4096.0     # additive bias on padded class columns: exp(-4096 - max)
                        # underflows to exactly 0 for any realistic running max,
                        # and n_pad * 4096 is exactly representable, so the
                        # sum(logits) accumulator is corrected exactly in the
                        # wrapper.  Padded columns never affect max / sumexp.


def _arcface_kernel(x_ref, y_ref, w_ref, *rest, s, m, has_bias, tiles_per_split):
    """Processes one (D, TILE_C) class tile of one class-range split.

    Grid: (n_split, tiles_per_split).  Axis 0 is 'parallel' (megacore on v7x),
    axis 1 streams the class tiles.  The four outputs are per-split (B, 1)
    partials that stay VMEM-resident across axis 1 (accumulator pattern).
    """
    if has_bias:
        (bias_ref, max_ref, sumexp_ref, sumlog_ref, tgtcos_ref, xn_ref) = rest
    else:
        bias_ref = None
        (max_ref, sumexp_ref, sumlog_ref, tgtcos_ref, xn_ref) = rest

    B, D = x_ref.shape
    _, TC = w_ref.shape
    p = pl.program_id(0)
    c = pl.program_id(1)

    # ---- per-split init: normalize x once, zero the accumulators ----
    @pl.when(c == 0)
    def _():
        x = x_ref[...].astype(jnp.float32)
        inv_xn = lax.rsqrt(jnp.maximum(jnp.sum(x * x, axis=1, keepdims=True), 1e-24))
        xn_ref[...] = (x * inv_xn).astype(xn_ref.dtype)
        max_ref[...] = jnp.full((B, 1), _NEG_INF, jnp.float32)
        sumexp_ref[...] = jnp.zeros((B, 1), jnp.float32)
        sumlog_ref[...] = jnp.zeros((B, 1), jnp.float32)
        tgtcos_ref[...] = jnp.zeros((B, 1), jnp.float32)

    # ---- cos_theta: MXU matmul on the raw w tile (native/stream dtype) then
    #      a (1, TC) rsqrt column scale (no whole-tile normalization) ----
    wt = w_ref[...]
    wf = wt.astype(jnp.float32)
    inv_wnorm = lax.rsqrt(jnp.maximum(jnp.sum(wf * wf, axis=0, keepdims=True), 1e-24))
    cos = jnp.dot(xn_ref[...], wt, preferred_element_type=jnp.float32) * inv_wnorm
    cos_c = jnp.clip(cos, -1.0 + 1e-05, 1.0 - 1e-05)               # (B, TC)

    col0 = (p * tiles_per_split + c) * TC
    col = col0 + lax.broadcasted_iota(jnp.int32, (B, TC), 1)
    onehot = col == y_ref[...]                                      # (B, TC)

    # ---- additive angular margin on the (B, 1) target cosine only ----
    cos_m = math.cos(m)
    sin_m = math.sin(m)
    pi_clamp = 3.14159
    thresh = math.cos(pi_clamp - m)   # theta + m > 3.14159  <=>  cos_c < thresh
    cos_pi = math.cos(pi_clamp)

    tgt_cos = jnp.sum(jnp.where(onehot, cos_c, 0.0), axis=1, keepdims=True)
    sin_t = jnp.sqrt(jnp.maximum(1.0 - tgt_cos * tgt_cos, 0.0))
    cos_tm = tgt_cos * cos_m - sin_t * sin_m
    cos_tm = jnp.where(tgt_cos < thresh, cos_pi, cos_tm)            # (B, 1)

    logits = s * jnp.where(onehot, cos_tm, cos_c)
    if has_bias:
        logits = logits + bias_ref[...]      # log(class_freq) and/or pad bias

    # ---- streaming (online) logsumexp + auxiliary accumulators ----
    tile_max = jnp.max(logits, axis=1, keepdims=True)
    m_prev = max_ref[...]
    m_new = jnp.maximum(m_prev, tile_max)
    sumexp_ref[...] = (sumexp_ref[...] * jnp.exp(m_prev - m_new)
                       + jnp.sum(jnp.exp(logits - m_new), axis=1, keepdims=True))
    max_ref[...] = m_new
    sumlog_ref[...] += jnp.sum(logits, axis=1, keepdims=True)
    tgtcos_ref[...] += tgt_cos


def arcface_loss(x, y, w, class_freq=None, *, s=64.0, m=0.5, balanced=False,
                 label_smoothing=0.1, tile_c=None, num_splits=2,
                 stream_dtype=None):
    """ArcFace loss.  x: (B, D), y: (B,) int, w: (D, C), class_freq: (C,).

    stream_dtype: dtype used to stream w and run the MXU matmul (pass
      jnp.bfloat16 to halve the w HBM traffic); None keeps w.dtype.
    num_splits: leading 'parallel' grid axis over class-range splits (2 keeps
      both TensorCores busy on v7x; harmless on single-core chips).
    """
    B, D = x.shape
    Dw, C = w.shape
    assert D == Dw
    if balanced:
        assert class_freq is not None

    mm_dtype = jnp.dtype(stream_dtype) if stream_dtype is not None else jnp.dtype(w.dtype)
    w_itemsize = mm_dtype.itemsize
    x_itemsize = jnp.dtype(x.dtype).itemsize
    lane = 128
    c_pad128 = pl.cdiv(C, lane) * lane

    # ---- generation-aware scoped-VMEM limit & B-aware tile_c budget ----
    try:
        phys_vmem = int(pltpu.get_tpu_info().vmem_capacity_bytes)
    except Exception:
        phys_vmem = 64 * 1024 * 1024          # conservative (v7x per-core size)
    vmem_limit = min(phys_vmem * 3 // 4, 96 * 1024 * 1024)

    if tile_c is None:
        fixed = (2 * B * D * x_itemsize       # x (double-buffered by pipeline)
                 + B * D * w_itemsize         # normalized-x scratch
                 + 2 * B * 4                  # y
                 + 512 * 1024)                # outputs / misc slack
        per_col = (2 * D * w_itemsize         # w tile, double-buffered
                   + 2 * 4                    # bias row, double-buffered
                   + 6 * B * 4)               # (B, TILE_C) f32 temporaries
        t = (vmem_limit * 4 // 5 - fixed) // max(per_col, 1)
        tile_c = min(max(lane, (t // lane) * lane), 32 * 1024, c_pad128)
    else:
        tile_c = min(pl.cdiv(tile_c, lane) * lane, c_pad128)

    # ---- split the class range for the 'parallel' axis ----
    tiles_total = pl.cdiv(C, tile_c)
    n_split = max(1, min(int(num_splits), tiles_total))
    tiles_per_split = pl.cdiv(tiles_total, n_split)
    c_pad = n_split * tiles_per_split * tile_c
    n_pad = c_pad - C
    has_bias = balanced or (n_pad > 0)

    w_in = w.astype(mm_dtype)
    if n_pad:
        w_in = jnp.pad(w_in, ((0, 0), (0, n_pad)))

    inputs = [x, y.reshape(B, 1).astype(jnp.int32), w_in]
    in_specs = [
        pl.BlockSpec((B, D), lambda p, c: (0, 0)),
        pl.BlockSpec((B, 1), lambda p, c: (0, 0)),
        pl.BlockSpec((D, tile_c), lambda p, c: (0, p * tiles_per_split + c)),
    ]
    if has_bias:
        if balanced:
            bias = jnp.log(class_freq.astype(jnp.float32)).reshape(1, C)
        else:
            bias = jnp.zeros((1, C), jnp.float32)
        if n_pad:
            bias = jnp.concatenate(
                [bias, jnp.full((1, n_pad), _PAD_BIAS, jnp.float32)], axis=1)
        inputs.append(bias)
        in_specs.append(
            pl.BlockSpec((1, tile_c), lambda p, c: (0, p * tiles_per_split + c)))

    part_shape = jax.ShapeDtypeStruct((n_split, B, 1), jnp.float32)
    part_spec = pl.BlockSpec((None, B, 1), lambda p, c: (p, 0, 0))

    kernel = functools.partial(
        _arcface_kernel, s=float(s), m=float(m), has_bias=has_bias,
        tiles_per_split=tiles_per_split)

    cost = pl.CostEstimate(
        flops=2 * B * D * c_pad + 2 * D * c_pad + 12 * B * c_pad,
        transcendentals=B * c_pad,
        bytes_accessed=(D * c_pad * w_itemsize + B * D * x_itemsize
                        + (c_pad * 4 if has_bias else 0) + B * 4
                        + 4 * n_split * B * 4),
    )

    mx, se, sl, tcs = pl.pallas_call(
        kernel,
        out_shape=(part_shape, part_shape, part_shape, part_shape),
        grid_spec=pltpu.PrefetchScalarGridSpec(
            num_scalar_prefetch=0,
            grid=(n_split, tiles_per_split),
            in_specs=in_specs,
            out_specs=(part_spec, part_spec, part_spec, part_spec),
            scratch_shapes=[pltpu.VMEM((B, D), mm_dtype)],
        ),
        compiler_params=pltpu.CompilerParams(
            dimension_semantics=("parallel", "arbitrary"),
            vmem_limit_bytes=int(vmem_limit),
        ),
        cost_estimate=cost,
    )(*inputs)

    # ---- merge per-split partials & finalize (tiny (B,) work, plain JAX) ----
    mx = mx[..., 0]     # (n_split, B)
    se = se[..., 0]
    sl = sl[..., 0]
    tcs = tcs[..., 0]

    gmax = jnp.max(mx, axis=0)                                     # (B,)
    sumexp = jnp.sum(se * jnp.exp(mx - gmax[None, :]), axis=0)
    lse = gmax + jnp.log(sumexp)
    sumlog = jnp.sum(sl, axis=0) - n_pad * _PAD_BIAS               # exact pad removal
    tgt_cos = jnp.sum(tcs, axis=0)

    # reconstruct the margin-adjusted target logit from the target cosine
    cos_m = math.cos(m)
    sin_m = math.sin(m)
    pi_clamp = 3.14159
    thresh = math.cos(pi_clamp - m)
    sin_t = jnp.sqrt(jnp.maximum(1.0 - tgt_cos * tgt_cos, 0.0))
    cos_tm = jnp.where(tgt_cos < thresh, math.cos(pi_clamp),
                       tgt_cos * cos_m - sin_t * sin_m)
    tgt_logit = s * cos_tm
    if balanced:
        tgt_logit = tgt_logit + jnp.log(class_freq.astype(jnp.float32))[y]

    nll = lse - tgt_logit
    smooth = lse - sumlog / C
    per = (1.0 - label_smoothing) * nll + label_smoothing * smooth
    return jnp.mean(per)


def _arcface_loss_ref(x, y, w, class_freq, *, s=64.0, m=0.5, balanced=False):
    """Pure-JAX reference mirroring the PyTorch module (for verification)."""
    x = x.astype(jnp.float32)
    w = w.astype(jnp.float32)
    wn = w / jnp.maximum(jnp.linalg.norm(w, axis=0, keepdims=True), 1e-12)
    xn = x / jnp.maximum(jnp.linalg.norm(x, axis=1, keepdims=True), 1e-12)
    cos_theta = xn @ wn
    theta = jnp.arccos(jnp.clip(cos_theta, -1 + 1e-05, 1 - 1e-05))
    onehot = jax.nn.one_hot(y, w.shape[1], dtype=jnp.float32)
    theta_m = jnp.clip(theta + m * onehot, 1e-05, 3.14159)
    d_theta = jnp.cos(theta_m) - cos_theta
    logits = s * (cos_theta + d_theta)
    if balanced:
        logits = logits + jnp.log(class_freq.astype(jnp.float32))[None, :]
    logp = jax.nn.log_softmax(logits, axis=1)
    eps = 0.1
    nll = -jnp.sum(onehot * logp, axis=1)
    smooth = -jnp.mean(logp, axis=1)
    return jnp.mean((1 - eps) * nll + eps * smooth)


if __name__ == "__main__":
    B, D, C = 8, 32, 200   # batch, feat_dim, num_class (C % 128 != 0 exercises padding)

    key = jax.random.PRNGKey(0)
    kx, ky, kw, kf = jax.random.split(key, 4)

    x = jax.random.normal(kx, (B, D), dtype=jnp.float32)
    y = jax.random.randint(ky, (B,), 0, C, dtype=jnp.int32)
    # xavier_normal_ init for w: std = sqrt(2 / (fan_in + fan_out))
    w = jax.random.normal(kw, (D, C), dtype=jnp.float32) * math.sqrt(2.0 / (D + C))
    class_freq = jax.random.randint(kf, (C,), 1, 100).astype(jnp.float32)

    # 1) f32 streaming, tile_c=128 -> grid (2 splits x 1 tile): exercises the
    #    padding bias, the streaming LSE and the split merge.
    loss = jax.block_until_ready(
        arcface_loss(x, y, w, class_freq, s=64.0, m=0.5, balanced=False, tile_c=128))
    ref = _arcface_loss_ref(x, y, w, class_freq, s=64.0, m=0.5, balanced=False)
    assert jnp.allclose(loss, ref, rtol=2e-3, atol=2e-3), (loss, ref)

    # 2) balanced mode with the auto (generation/B-aware) tile_c heuristic.
    loss_b = jax.block_until_ready(
        arcface_loss(x, y, w, class_freq, s=64.0, m=0.5, balanced=True))
    ref_b = _arcface_loss_ref(x, y, w, class_freq, s=64.0, m=0.5, balanced=True)
    assert jnp.allclose(loss_b, ref_b, rtol=2e-3, atol=2e-3), (loss_b, ref_b)

    # 3) no-padding / no-bias fast path (C a multiple of tile_c).
    C2 = 256
    w2 = jax.random.normal(kw, (D, C2), dtype=jnp.float32) * math.sqrt(2.0 / (D + C2))
    y2 = jax.random.randint(ky, (B,), 0, C2, dtype=jnp.int32)
    cf2 = jnp.ones((C2,), jnp.float32)
    loss2 = jax.block_until_ready(
        arcface_loss(x, y2, w2, cf2, s=64.0, m=0.5, balanced=False, tile_c=128))
    ref2 = _arcface_loss_ref(x, y2, w2, cf2, s=64.0, m=0.5, balanced=False)
    assert jnp.allclose(loss2, ref2, rtol=2e-3, atol=2e-3), (loss2, ref2)

    # 4) bf16-streamed w (halves the dominant HBM traffic); looser tolerance
    #    because the cosine is computed from bf16 operands.
    loss_bf = jax.block_until_ready(
        arcface_loss(x, y, w, class_freq, s=64.0, m=0.5, balanced=False,
                     tile_c=128, stream_dtype=jnp.bfloat16))
    assert jnp.allclose(loss_bf, ref, rtol=3e-2, atol=3e-2), (loss_bf, ref)

    print("KERNEL_OK")
</pallas_src>

<mosaic_0001>
module attributes {stable_mosaic.version = 11 : i64} {
  func.func @_arcface_kernel(%arg0: i32, %arg1: i32, %arg2: memref<8x32xf32, #tpu.memory_space<vmem>>, %arg3: memref<8x1xi32, #tpu.memory_space<vmem>>, %arg4: memref<32x128xf32, #tpu.memory_space<vmem>>, %arg5: memref<1x128xf32, #tpu.memory_space<vmem>>, %arg6: memref<1x8x1xf32, #tpu.memory_space<vmem>>, %arg7: memref<1x8x1xf32, #tpu.memory_space<vmem>>, %arg8: memref<1x8x1xf32, #tpu.memory_space<vmem>>, %arg9: memref<1x8x1xf32, #tpu.memory_space<vmem>>, %arg10: memref<8x32xf32, #tpu.memory_space<vmem>>) attributes {dimension_semantics = [#tpu.dimension_semantics<parallel>, #tpu.dimension_semantics<arbitrary>], iteration_bounds = array<i64: 2, 1>, scalar_prefetch = 0 : i64, scratch_operands = 1 : i64, tpu.core_type = #tpu.core_type<tc>, window_params = [{pipeline_mode = #tpu.pipeline_mode<synchronous>, transform_indices = @transform_0, window_bounds = array<i64: 8, 32>}, {pipeline_mode = #tpu.pipeline_mode<synchronous>, transform_indices = @transform_1, window_bounds = array<i64: 8, 1>}, {transform_indices = @transform_2, window_bounds = array<i64: 32, 128>}, {transform_indices = @transform_3, window_bounds = array<i64: 1, 128>}, {transform_indices = @transform_4, window_bounds = array<i64: 1, 8, 1>}, {transform_indices = @transform_5, window_bounds = array<i64: 1, 8, 1>}, {transform_indices = @transform_6, window_bounds = array<i64: 1, 8, 1>}, {transform_indices = @transform_7, window_bounds = array<i64: 1, 8, 1>}]} {
    %c0_i32 = arith.constant 0 : i32
    %0 = arith.cmpi eq, %arg1, %c0_i32 : i32
    %1 = arith.extui %0 : i1 to i32
    %c0_i32_0 = arith.constant 0 : i32
    %2 = arith.cmpi ne, %1, %c0_i32_0 : i32
    scf.if %2 {
      %c0_48 = arith.constant 0 : index
      %c0_49 = arith.constant 0 : index
      %90 = vector.load %arg2[%c0_48, %c0_49] : memref<8x32xf32, #tpu.memory_space<vmem>>, vector<8x32xf32>
      %91 = arith.mulf %90, %90 : vector<8x32xf32>
      %cst_50 = arith.constant dense<0.000000e+00> : vector<8xf32>
      %92 = vector.multi_reduction <add>, %91, %cst_50 [1] : vector<8x32xf32> to vector<8xf32>
      %93 = vector.shape_cast %92 : vector<8xf32> to vector<8x1xf32>
      %cst_51 = arith.constant 1.000000e-24 : f32
      %94 = vector.broadcast %cst_51 : f32 to vector<8x1xf32>
      %95 = arith.maximumf %93, %94 : vector<8x1xf32>
      %96 = math.rsqrt %95 : vector<8x1xf32>
      %97 = vector.broadcast %96 : vector<8x1xf32> to vector<8x32xf32>
      %98 = arith.mulf %90, %97 : vector<8x32xf32>
      %c0_52 = arith.constant 0 : index
      %c0_53 = arith.constant 0 : index
      %99 = vector.load %arg10[%c0_52, %c0_53] : memref<8x32xf32, #tpu.memory_space<vmem>>, vector<8x32xf32>
      tpu.vector_store %arg10[%c0_52, %c0_53], %98 {strides = array<i32>} : memref<8x32xf32, #tpu.memory_space<vmem>>, vector<8x32xf32>,
      %cst_54 = arith.constant -1.000000e+30 : f32
      %100 = vector.broadcast %cst_54 : f32 to vector<8x1xf32>
      %c0_55 = arith.constant 0 : index
      %c0_56 = arith.constant 0 : index
      %c0_57 = arith.constant 0 : index
      %101 = vector.load %arg6[%c0_55, %c0_56, %c0_57] : memref<1x8x1xf32, #tpu.memory_space<vmem>>, vector<1x8x1xf32>
      %102 = vector.shape_cast %101 : vector<1x8x1xf32> to vector<8x1xf32>
      %103 = vector.shape_cast %100 : vector<8x1xf32> to vector<1x8x1xf32>
      tpu.vector_store %arg6[%c0_55, %c0_56, %c0_57], %103 {strides = array<i32>} : memref<1x8x1xf32, #tpu.memory_space<vmem>>, vector<1x8x1xf32>,
      %cst_58 = arith.constant 0.000000e+00 : f32
      %104 = vector.broadcast %cst_58 : f32 to vector<8x1xf32>
      %c0_59 = arith.constant 0 : index
      %c0_60 = arith.constant 0 : index
      %c0_61 = arith.constant 0 : index
      %105 = vector.load %arg7[%c0_59, %c0_60, %c0_61] : memref<1x8x1xf32, #tpu.memory_space<vmem>>, vector<1x8x1xf32>
      %106 = vector.shape_cast %105 : vector<1x8x1xf32> to vector<8x1xf32>
      %107 = vector.shape_cast %104 : vector<8x1xf32> to vector<1x8x1xf32>
      tpu.vector_store %arg7[%c0_59, %c0_60, %c0_61], %107 {strides = array<i32>} : memref<1x8x1xf32, #tpu.memory_space<vmem>>, vector<1x8x1xf32>,
      %cst_62 = arith.constant 0.000000e+00 : f32
      %108 = vector.broadcast %cst_62 : f32 to vector<8x1xf32>
      %c0_63 = arith.constant 0 : index
      %c0_64 = arith.constant 0 : index
      %c0_65 = arith.constant 0 : index
      %109 = vector.load %arg8[%c0_63, %c0_64, %c0_65] : memref<1x8x1xf32, #tpu.memory_space<vmem>>, vector<1x8x1xf32>
      %110 = vector.shape_cast %109 : vector<1x8x1xf32> to vector<8x1xf32>
      %111 = vector.shape_cast %108 : vector<8x1xf32> to vector<1x8x1xf32>
      tpu.vector_store %arg8[%c0_63, %c0_64, %c0_65], %111 {strides = array<i32>} : memref<1x8x1xf32, #tpu.memory_space<vmem>>, vector<1x8x1xf32>,
      %cst_66 = arith.constant 0.000000e+00 : f32
      %112 = vector.broadcast %cst_66 : f32 to vector<8x1xf32>
      %c0_67 = arith.constant 0 : index
      %c0_68 = arith.constant 0 : index
      %c0_69 = arith.constant 0 : index
      %113 = vector.load %arg9[%c0_67, %c0_68, %c0_69] : memref<1x8x1xf32, #tpu.memory_space<vmem>>, vector<1x8x1xf32>
      %114 = vector.shape_cast %113 : vector<1x8x1xf32> to vector<8x1xf32>
      %115 = vector.shape_cast %112 : vector<8x1xf32> to vector<1x8x1xf32>
      tpu.vector_store %arg9[%c0_67, %c0_68, %c0_69], %115 {strides = array<i32>} : memref<1x8x1xf32, #tpu.memory_space<vmem>>, vector<1x8x1xf32>,
    } else {
    }
    %c0 = arith.constant 0 : index
    %c0_1 = arith.constant 0 : index
    %3 = vector.load %arg4[%c0, %c0_1] : memref<32x128xf32, #tpu.memory_space<vmem>>, vector<32x128xf32>
    %4 = arith.mulf %3, %3 : vector<32x128xf32>
    %cst = arith.constant dense<0.000000e+00> : vector<128xf32>
    %5 = vector.multi_reduction <add>, %4, %cst [0] : vector<32x128xf32> to vector<128xf32>
    %6 = vector.shape_cast %5 : vector<128xf32> to vector<1x128xf32>
    %cst_2 = arith.constant 1.000000e-24 : f32
    %7 = vector.broadcast %cst_2 : f32 to vector<1x128xf32>
    %8 = arith.maximumf %6, %7 : vector<1x128xf32>
    %9 = math.rsqrt %8 : vector<1x128xf32>
    %c0_3 = arith.constant 0 : index
    %c0_4 = arith.constant 0 : index
    %10 = vector.load %arg10[%c0_3, %c0_4] : memref<8x32xf32, #tpu.memory_space<vmem>>, vector<8x32xf32>
    %cst_5 = arith.constant dense<0.000000e+00> : vector<8x128xf32>
    %11 = tpu.matmul %10, %3, %cst_5 {dimension_numbers = #tpu.dot_dimension_numbers<[1], [0], [0], [1], [0, 0, 1, 1], [], []>} : vector<8x32xf32>, vector<32x128xf32>, vector<8x128xf32> -> vector<8x128xf32>
    %12 = vector.broadcast %9 : vector<1x128xf32> to vector<8x128xf32>
    %13 = arith.mulf %11, %12 : vector<8x128xf32>
    %cst_6 = arith.constant -0.999989986 : f32
    %cst_7 = arith.constant 0.999989986 : f32
    %14 = vector.broadcast %cst_6 : f32 to vector<8x128xf32>
    %15 = arith.maximumf %14, %13 : vector<8x128xf32>
    %16 = vector.broadcast %cst_7 : f32 to vector<8x128xf32>
    %17 = arith.minimumf %16, %15 : vector<8x128xf32>
    %c1_i32 = arith.constant 1 : i32
    %18 = arith.muli %arg0, %c1_i32 : i32
    %19 = arith.addi %18, %arg1 : i32
    %c128_i32 = arith.constant 128 : i32
    %20 = arith.muli %19, %c128_i32 : i32
    %21 = tpu.iota {dimensions = array<i32: 1>} : vector<8x128xi32>
    %22 = vector.broadcast %20 : i32 to vector<8x128xi32>
    %23 = arith.addi %22, %21 : vector<8x128xi32>
    %c0_8 = arith.constant 0 : index
    %c0_9 = arith.constant 0 : index
    %24 = vector.load %arg3[%c0_8, %c0_9] : memref<8x1xi32, #tpu.memory_space<vmem>>, vector<8x1xi32>
    %25 = vector.broadcast %24 : vector<8x1xi32> to vector<8x128xi32>
    %26 = arith.cmpi eq, %23, %25 : vector<8x128xi32>
    %cst_10 = arith.constant 0.000000e+00 : f32
    %27 = vector.broadcast %cst_10 : f32 to vector<8x128xf32>
    %28 = arith.select %26, %17, %27 : vector<8x128xi1>, vector<8x128xf32>
    %cst_11 = arith.constant dense<0.000000e+00> : vector<8xf32>
    %29 = vector.multi_reduction <add>, %28, %cst_11 [1] : vector<8x128xf32> to vector<8xf32>
    %30 = vector.shape_cast %29 : vector<8xf32> to vector<8x1xf32>
    %31 = arith.mulf %30, %30 : vector<8x1xf32>
    %cst_12 = arith.constant 1.000000e+00 : f32
    %32 = vector.broadcast %cst_12 : f32 to vector<8x1xf32>
    %33 = arith.subf %32, %31 : vector<8x1xf32>
    %cst_13 = arith.constant 0.000000e+00 : f32
    %34 = vector.broadcast %cst_13 : f32 to vector<8x1xf32>
    %35 = arith.maximumf %33, %34 : vector<8x1xf32>
    %36 = math.sqrt %35 : vector<8x1xf32>
    %cst_14 = arith.constant 0.87758255 : f32
    %37 = vector.broadcast %cst_14 : f32 to vector<8x1xf32>
    %38 = arith.mulf %30, %37 : vector<8x1xf32>
    %cst_15 = arith.constant 0.47942555 : f32
    %39 = vector.broadcast %cst_15 : f32 to vector<8x1xf32>
    %40 = arith.mulf %36, %39 : vector<8x1xf32>
    %41 = arith.subf %38, %40 : vector<8x1xf32>
    %cst_16 = arith.constant -0.877581298 : f32
    %42 = vector.broadcast %cst_16 : f32 to vector<8x1xf32>
    %43 = arith.cmpf olt, %30, %42 : vector<8x1xf32>
    %cst_17 = arith.constant -1.000000e+00 : f32
    %44 = vector.broadcast %cst_17 : f32 to vector<8x1xf32>
    %45 = arith.select %43, %44, %41 : vector<8x1xi1>, vector<8x1xf32>
    %46 = vector.shape_cast %45 : vector<8x1xf32> to vector<8x1xf32>
    %47 = vector.broadcast %46 : vector<8x1xf32> to vector<8x128xf32>
    %48 = arith.select %26, %47, %17 : vector<8x128xi1>, vector<8x128xf32>
    %cst_18 = arith.constant 6.400000e+01 : f32
    %49 = vector.broadcast %cst_18 : f32 to vector<8x128xf32>
    %50 = arith.mulf %49, %48 : vector<8x128xf32>
    %c0_19 = arith.constant 0 : index
    %c0_20 = arith.constant 0 : index
    %51 = vector.load %arg5[%c0_19, %c0_20] : memref<1x128xf32, #tpu.memory_space<vmem>>, vector<1x128xf32>
    %52 = vector.broadcast %51 : vector<1x128xf32> to vector<8x128xf32>
    %53 = arith.addf %50, %52 : vector<8x128xf32>
    %cst_21 = arith.constant dense<0xFF800000> : vector<8xf32>
    %54 = vector.multi_reduction <maximumf>, %53, %cst_21 [1] : vector<8x128xf32> to vector<8xf32>
    %55 = vector.shape_cast %54 : vector<8xf32> to vector<8x1xf32>
    %c0_22 = arith.constant 0 : index
    %c0_23 = arith.constant 0 : index
    %c0_24 = arith.constant 0 : index
    %56 = vector.load %arg6[%c0_22, %c0_23, %c0_24] : memref<1x8x1xf32, #tpu.memory_space<vmem>>, vector<1x8x1xf32>
    %57 = vector.shape_cast %56 : vector<1x8x1xf32> to vector<8x1xf32>
    %58 = arith.maximumf %57, %55 : vector<8x1xf32>
    %c0_25 = arith.constant 0 : index
    %c0_26 = arith.constant 0 : index
    %c0_27 = arith.constant 0 : index
    %59 = vector.load %arg7[%c0_25, %c0_26, %c0_27] : memref<1x8x1xf32, #tpu.memory_space<vmem>>, vector<1x8x1xf32>
    %60 = vector.shape_cast %59 : vector<1x8x1xf32> to vector<8x1xf32>
    %61 = arith.subf %57, %58 : vector<8x1xf32>
    %62 = math.exp %61 : vector<8x1xf32>
    %63 = arith.mulf %60, %62 : vector<8x1xf32>
    %64 = vector.broadcast %58 : vector<8x1xf32> to vector<8x128xf32>
    %65 = arith.subf %53, %64 : vector<8x128xf32>
    %66 = math.exp %65 : vector<8x128xf32>
    %cst_28 = arith.constant dense<0.000000e+00> : vector<8xf32>
    %67 = vector.multi_reduction <add>, %66, %cst_28 [1] : vector<8x128xf32> to vector<8xf32>
    %68 = vector.shape_cast %67 : vector<8xf32> to vector<8x1xf32>
    %69 = arith.addf %63, %68 : vector<8x1xf32>
    %c0_29 = arith.constant 0 : index
    %c0_30 = arith.constant 0 : index
    %c0_31 = arith.constant 0 : index
    %70 = vector.load %arg7[%c0_29, %c0_30, %c0_31] : memref<1x8x1xf32, #tpu.memory_space<vmem>>, vector<1x8x1xf32>
    %71 = vector.shape_cast %70 : vector<1x8x1xf32> to vector<8x1xf32>
    %72 = vector.shape_cast %69 : vector<8x1xf32> to vector<1x8x1xf32>
    tpu.vector_store %arg7[%c0_29, %c0_30, %c0_31], %72 {strides = array<i32>} : memref<1x8x1xf32, #tpu.memory_space<vmem>>, vector<1x8x1xf32>,
    %c0_32 = arith.constant 0 : index
    %c0_33 = arith.constant 0 : index
    %c0_34 = arith.constant 0 : index
    %73 = vector.load %arg6[%c0_32, %c0_33, %c0_34] : memref<1x8x1xf32, #tpu.memory_space<vmem>>, vector<1x8x1xf32>
    %74 = vector.shape_cast %73 : vector<1x8x1xf32> to vector<8x1xf32>
    %75 = vector.shape_cast %58 : vector<8x1xf32> to vector<1x8x1xf32>
    tpu.vector_store %arg6[%c0_32, %c0_33, %c0_34], %75 {strides = array<i32>} : memref<1x8x1xf32, #tpu.memory_space<vmem>>, vector<1x8x1xf32>,
    %c0_35 = arith.constant 0 : index
    %c0_36 = arith.constant 0 : index
    %c0_37 = arith.constant 0 : index
    %76 = vector.load %arg8[%c0_35, %c0_36, %c0_37] : memref<1x8x1xf32, #tpu.memory_space<vmem>>, vector<1x8x1xf32>
    %77 = vector.shape_cast %76 : vector<1x8x1xf32> to vector<8x1xf32>
    %cst_38 = arith.constant dense<0.000000e+00> : vector<8xf32>
    %78 = vector.multi_reduction <add>, %53, %cst_38 [1] : vector<8x128xf32> to vector<8xf32>
    %79 = vector.shape_cast %78 : vector<8xf32> to vector<8x1xf32>
    %80 = arith.addf %77, %79 : vector<8x1xf32>
    %c0_39 = arith.constant 0 : index
    %c0_40 = arith.constant 0 : index
    %c0_41 = arith.constant 0 : index
    %81 = vector.load %arg8[%c0_39, %c0_40, %c0_41] : memref<1x8x1xf32, #tpu.memory_space<vmem>>, vector<1x8x1xf32>
    %82 = vector.shape_cast %81 : vector<1x8x1xf32> to vector<8x1xf32>
    %83 = vector.shape_cast %80 : vector<8x1xf32> to vector<1x8x1xf32>
    tpu.vector_store %arg8[%c0_39, %c0_40, %c0_41], %83 {strides = array<i32>} : memref<1x8x1xf32, #tpu.memory_space<vmem>>, vector<1x8x1xf32>,
    %c0_42 = arith.constant 0 : index
    %c0_43 = arith.constant 0 : index
    %c0_44 = arith.constant 0 : index
    %84 = vector.load %arg9[%c0_42, %c0_43, %c0_44] : memref<1x8x1xf32, #tpu.memory_space<vmem>>, vector<1x8x1xf32>
    %85 = vector.shape_cast %84 : vector<1x8x1xf32> to vector<8x1xf32>
    %86 = arith.addf %85, %30 : vector<8x1xf32>
    %c0_45 = arith.constant 0 : index
    %c0_46 = arith.constant 0 : index
    %c0_47 = arith.constant 0 : index
    %87 = vector.load %arg9[%c0_45, %c0_46, %c0_47] : memref<1x8x1xf32, #tpu.memory_space<vmem>>, vector<1x8x1xf32>
    %88 = vector.shape_cast %87 : vector<1x8x1xf32> to vector<8x1xf32>
    %89 = vector.shape_cast %86 : vector<8x1xf32> to vector<1x8x1xf32>
    tpu.vector_store %arg9[%c0_45, %c0_46, %c0_47], %89 {strides = array<i32>} : memref<1x8x1xf32, #tpu.memory_space<vmem>>, vector<1x8x1xf32>,
    return
  }
  func.func @transform_0(%arg0: i32, %arg1: i32) -> (i32, i32) {
    %c0_i32 = arith.constant 0 : i32
    %c0_i32_0 = arith.constant 0 : i32
    %c0_i32_1 = arith.constant 0 : i32
    return %c0_i32, %c0_i32_0 : i32, i32
  }
  func.func @transform_1(%arg0: i32, %arg1: i32) -> (i32, i32) {
    %c0_i32 = arith.constant 0 : i32
    %c0_i32_0 = arith.constant 0 : i32
    %c0_i32_1 = arith.constant 0 : i32
    return %c0_i32, %c0_i32_0 : i32, i32
  }
  func.func @transform_2(%arg0: i32, %arg1: i32) -> (i32, i32) {
    %c1_i32 = arith.constant 1 : i32
    %0 = arith.muli %arg0, %c1_i32 : i32
    %1 = arith.addi %0, %arg1 : i32
    %c0_i32 = arith.constant 0 : i32
    %c0_i32_0 = arith.constant 0 : i32
    return %c0_i32, %1 : i32, i32
  }
  func.func @transform_3(%arg0: i32, %arg1: i32) -> (i32, i32) {
    %c1_i32 = arith.constant 1 : i32
    %0 = arith.muli %arg0, %c1_i32 : i32
    %1 = arith.addi %0, %arg1 : i32
    %c0_i32 = arith.constant 0 : i32
    %c0_i32_0 = arith.constant 0 : i32
    return %c0_i32, %1 : i32, i32
  }
  func.func @transform_4(%arg0: i32, %arg1: i32) -> (i32, i32, i32) {
    %c0_i32 = arith.constant 0 : i32
    %c0_i32_0 = arith.constant 0 : i32
    %c0_i32_1 = arith.constant 0 : i32
    return %arg0, %c0_i32, %c0_i32_0 : i32, i32, i32
  }
  func.func @transform_5(%arg0: i32, %arg1: i32) -> (i32, i32, i32) {
    %c0_i32 = arith.constant 0 : i32
    %c0_i32_0 = arith.constant 0 : i32
    %c0_i32_1 = arith.constant 0 : i32
    return %arg0, %c0_i32, %c0_i32_0 : i32, i32, i32
  }
  func.func @transform_6(%arg0: i32, %arg1: i32) -> (i32, i32, i32) {
    %c0_i32 = arith.constant 0 : i32
    %c0_i32_0 = arith.constant 0 : i32
    %c0_i32_1 = arith.constant 0 : i32
    return %arg0, %c0_i32, %c0_i32_0 : i32, i32, i32
  }
  func.func @transform_7(%arg0: i32, %arg1: i32) -> (i32, i32, i32) {
    %c0_i32 = arith.constant 0 : i32
    %c0_i32_0 = arith.constant 0 : i32
    %c0_i32_1 = arith.constant 0 : i32
    return %arg0, %c0_i32, %c0_i32_0 : i32, i32, i32
  }
}

</mosaic_0001>

<bundles_post_ra>
// kernel: tpu_custom_call.1
= control target key start
LH: loop header
LB: loop body
LE: loop exit
PB: predicated region body
PF: predicated region fallthrough
CT: control target
= control target key end

     0   :  { %13 = vsyncpa [#allocation4], 0  ;;  %s1154_s0 = inlined_call_operand.vmem [shape: f32[8,32], index: 0, kind: input, shape index: {}]   ;;  %s1155_s1 = inlined_call_operand.vmem [shape: s32[8,1], index: 1, kind: input, shape index: {}]   ;;  %s1156_s2 = inlined_call_operand.hbm [shape: f32[32,256], index: 2, kind: input, shape index: {}]   ;;  %s1157_s3 = inlined_call_operand.vmem [shape: f32[1,256], index: 3, kind: input, shape index: {}]   ;;  %s1158_s4 = inlined_call_operand.vmem [shape: f32[2,8,1], index: 4, kind: output, shape index: {0}]   ;;  %s1159_s5 = inlined_call_operand.vmem [shape: f32[2,8,1], index: 5, kind: output, shape index: {1}]   ;;  %s1160_s6 = inlined_call_operand.vmem [shape: f32[2,8,1], index: 6, kind: output, shape index: {2}]   ;;  %s1161_s7 = inlined_call_operand.vmem [shape: f32[2,8,1], index: 7, kind: output, shape index: {3}]  }
   0x1   :  { %15 = vsyncpa [#allocation4 + $0x1], 0  ;;  %s972_s24 = smov 0   ;;  %s974_s25 = smov 0  }
   0x2   :  { %s976_s26 = smov 0   ;;  %s978_s27 = smov 0  }
   0x3   :  { %s980_s28 = smov 0   ;;  %s982_s29 = smov 0  }
   0x4 LB: > { %s726_s30 = sadd.s32 4294967295, %s921_s29   ;;  %s33_s8 = sadd.s32 1, %s917_s28  ;;  %s921_s29 = sphi %s982_s29, %s21_s29   ;;  %s917_s28 = sphi %s980_s28, %s1170_s28   ;;  %s913_s27 = sphi %s978_s27, %s1169_s27   ;;  %s909_s26 = sphi %s976_s26, %s1168_s26   ;;  %s905_s25 = sphi %s974_s25, %s1167_s25   ;;  %s901_s24 = sphi %s972_s24, %s1166_s24  }
   0x5   : > { %p35_p0 = scmp.ge.s32.totalorder %s33_s8, 2  ;;  %s84_s9 = sadd.s32 1, %s909_s26 }
   0x6   : > { %p91_p1 = scmp.ne.s32.totalorder %s909_s26, %s905_s25  ;;  %p92_p2 = scmp.eq.s32.totalorder %s921_s29, 0 }
   0x7   : > { %s1172_s8 = smov (%p35_p0, %s33_s8), 0  ;;  %p97_p4 = scmp.ne.s32.totalorder %s905_s25, %s901_s24 }
   0x8   : > { %p1008_p3 = por %p92_p2, %p91_p1  ;;  %s81_s11 = ssub.s32 %s917_s28, %s1172_s8 }
   0x9   : > { %p98_p5 = scmp.eq.s32.totalorder %s726_s30, 0  ;;  %p82_p6 = scmp.eq.s32.totalorder %s81_s11, 0 }
   0xa   : > { %p772_p8 = scmp.lt.s32.totalorder %s921_s29, 2  ;;  %s259_s14 = sand.u32 1, %s909_s26  }
   0xb   : > { %p1015_p7 = por %p98_p5, %p97_p4  ;;  %s731_s15 = sshll.u32 %s917_s28, 7 }
   0xc   : > { %s1021_s13 = scalar_select %p82_p6, %s909_s26, %s84_s9  }
   0xd   : > { %s730_s16 = sshll.u32 %s259_s14, 5  ;;  %s1028_s19 = scalar_lea.hbm %s1156_s2, %s731_s15 }
   0xe   : > { %s263_s20 = scalar_lea.vmem [#allocation3], %s730_s16  ;;  %p1032_p9 = pnand %p772_p8, %p1008_p3 }
   0xf   : > { %s270_s21 = sshll.u32 %s263_s20, 4  ;;  %s1039_s23 = scalar_lea.sflag [#allocation4], %s259_s14  ;;  %s1036_s21 = int_to_ptr.vmem [resolvable:$true] %s270_s21 }
  0x10   : > { %s841_s24 = scalar_lea.hbm %s1028_s19, 512  ;;  %p843_p12 = pneg %p1032_p9 }
  0x11   : > { %p842_p11 = scmp.ne.s32.totalorder %s1028_s19, %s841_s24  ;;  %s846_s10 = scalar_lea.hbm %s1156_s2, 1024 }
  0x12   : > { %p847_p1 = scmp.lt.u32.totalorder %s1028_s19, %s1156_s2  ;;  %p848_p2 = scmp.lt.u32.totalorder %s846_s10, %s841_s24 }
  0x13   : > { %p844_p13 = pnand %p843_p12, %p842_p11  ;;  %p850_p4 = scmp.lt.u32.totalorder %s841_s24, %s1028_s19 }
  0x14   : > { %p849_p3 = por %p848_p2, %p847_p1 }
  0x15   : > { %p845_p0 = pneg %p844_p13 }
  0x16   : > { %p851_p5 = por %p850_p4, %p849_p3 }
  0x18   : > { %p852_p6 = pnand %p851_p5, %p845_p0 }
  0x1a   : > { %855 = shalt.err (!%p852_p6)
}
  0x1b   : > { %s856_s14 = scalar_lea.vmem %s1036_s21, 512  ;;  %s923_s16 = smov [#allocation3]  }
  0x1c   : > { %p857_p8 = scmp.ne.s32.totalorder %s1036_s21, %s856_s14  ;;  %s861_s17 = sshll.u32 %s923_s16, 4  ;;  %s862_s17 = int_to_ptr.vmem [resolvable:$false] %s861_s17 }
  0x1d   : > { %s863_s18 = scalar_lea.vmem %s862_s17, 1024  ;;  %p864_p10 = scmp.lt.s32.totalorder %s1036_s21, %s862_s17 }
  0x1e   : > { %p859_p11 = pnand %p857_p8, %p843_p12  ;;  %p865_p1 = scmp.lt.s32.totalorder %s863_s18, %s856_s14 }
  0x20   : > { %p860_p13 = pneg %p859_p11  ;;  %p866_p2 = por %p865_p1, %p864_p10 }
  0x22   : > { %p867_p3 = pnand %p866_p2, %p860_p13 }
  0x24   : > { %870 = shalt.err (!%p867_p3)
}
  0x25   : > { %s924_s20 = smov 256   ;;  %s925_s24 = smov 128  }
  0x26   : > { %s926_s30 = smov 8   ;;  %p286_p12 = scmp.lt.s32.totalorder %s921_s29, 3 }
  0x27   : > { %771 = dma.hbm_to_vmem [thread:$0]  (!%p1032_p9), %s1028_s19, 512, %s1036_s21, %s1039_s23, %s924_s20, %s925_s24, %s926_s30  }
  0x28   : > { %p1165_p0 = scmp.ge.s32.totalorder %s921_s29, 1 }
  0x2a   : > { %p287_p4 = pnand %p1165_p0, %p286_p12 }
  0x2b   : > { %s292_s9 = sand.u32 (!%p287_p4), 1, %s905_s25  }
  0x2c   : > { %290 = sbr.rel (%p287_p4) target bundleno = 1043 (0x413), region = 36  ;;  %s733_s10 = sshll.u32 (!%p287_p4), %s292_s9, 5 }
  0x2d   : > { %s293_s11 = scalar_lea.sflag (!%p287_p4), [#allocation4], %s292_s9  ;;  %s296_s15 = scalar_lea.vmem (!%p287_p4), [#allocation3], %s733_s10 }
  0x33   : > { %896 = dma.done.wait (%p1015_p7), %s293_s11, 512  }
  0x34   : > { %898 = vsyncadd (%p1015_p7), %s293_s11, 4294966784  ;;  %v368_v0 = vld [vmem:[%s1154_s0] sm:$0xff]  ;;  %vm370_vm0 = vcmask 261120   ;;  %v383_v3 = vld [vmem:[%s296_s15] sm:$0xff]  ;;  %v927_v6 = vmov 0.0|0.0   ;;  %p344_p7 = scmp.lt.s32.totalorder %s913_s27, 1  ;;  %v482_v32 = vlaneseq }
  0x35   : > { %v369_v1 = vmul.f32 %v368_v0, %v368_v0  ;;  %v384_v4 = vld [vmem:[%s296_s15 + $0x8] sm:$0xff]  ;;  %760 = vmatprep.subr.bf16.mxu0 %v927_v6  ;;  %v387_v7 = vmul.f32 %v383_v3, %v383_v3  ;;  %v385_v9 = vld [vmem:[%s296_s15 + $0x10] sm:$0xff]  ;;  %v386_v10 = vld [vmem:[%s296_s15 + $0x18] sm:$0xff]  ;;  %vm928_vm1 = vmmov 0   ;;  %v929_v15 = vmov 0.0   ;;  %s740_s20 = sshll.u32 %s913_s27, 7 }
  0x36   : > { %v761_v5 = vpack.c.bf16 %v384_v4, %v383_v3  ;;  %v388_v8 = vmul.f32 %v384_v4, %v384_v4  ;;  %v389_v11 = vmul.f32 %v385_v9, %v385_v9  ;;  %v764_v12 = vpack.c.bf16 %v386_v10, %v385_v9  ;;  %s1081_s12 = scalar_select %p344_p7, %s913_s27, 1  ;;  %757 = vmatprep.mubr.msk.f32.mxu0 %vm928_vm1, %v929_v15  ;;  %v486_v18 = vld [vmem:[%s1155_s1] sm:$0xff] }
  0x37   : > { %v371_v2 = vsel %vm370_vm0, %v369_v1, 0.0  ;;  %v390_v14 = vmul.f32 %v386_v10, %v386_v10  ;;  %vm378_vm2 = vcmask 7168   ;;  %v930_v19 = vmov 0  }
  0x38   : > { %372 = vadd.xlane.f32.xlu0 %v371_v2  ;;  %762 = vmatpush3.bf16.msra.mxu0 %v761_v5  ;;  %v391_v13 = vadd.f32 %v388_v8, %v387_v7  ;;  %s1085_s19 = sshll.u32 %s1081_s12, 3  ;;  %v483_v33 = vand.u32 127, %v482_v32  ;;  %v484_v34 = vstv %s740_s20  ;;  %s346_s11 = scalar_lea.vmem %s1157_s3, %s1081_s12  ;;  %v931_v62 = vmov -1e+30  }
  0x39   : > { %763 = vmatprep.subr.bf16.mxu0 %v927_v6  ;;  %s1091_s23 = scalar_lea.vmem %s1161_s7, %s1085_s19  ;;  %829 = vset.pattern.permute.xlu0 %v930_v19  ;;  %s1107_s9 = scalar_lea.vmem %s1160_s6, %s1085_s19  ;;  %v741_v59 = vld [vmem:[%s346_s11] ss:$0 sm:$0xff] }
  0x3a   : > { %v392_v16 = vadd.f32 %v391_v13, %v389_v11  ;;  %382 = vst.msk [vmem:[%s1091_s23] sm:$0xff] %vm378_vm2, %v929_v15  ;;  %830 = vset.pattern.permute.xlu1 %v930_v19  ;;  %v485_v36 = vadd.s32 %v484_v34, %v483_v33  ;;  %381 = vst.msk [vmem:[%s1107_s9] sm:$0xff] %vm378_vm2, %v929_v15  ;;  %s351_s16 = scalar_lea.vmem %s1158_s4, %s1085_s19  ;;  %s355_s12 = scalar_lea.vmem %s1159_s5, %s1085_s19 }
  0x3b   : > { %379 = vst.msk [vmem:[%s351_s16] sm:$0xff] %vm378_vm2, %v931_v62  ;;  %380 = vst.msk [vmem:[%s355_s12] sm:$0xff] %vm378_vm2, %v929_v15 }
  0x3c   : > { %765 = vmatpush3.bf16.msra.mxu0 %v764_v12  ;;  %v393_v17 = vadd.f32 %v392_v16, %v390_v14 }
  0x3e   : > { %v394_v25 = vrot.slane %v393_v17, 4 }
  0x40   : > { %v395_v26 = vadd.f32 %v394_v25, %v393_v17 }
  0x41   : > { %v547_v43 = vld [vmem:[%s1091_s23] sm:$0xff] }
  0x42   : > { %v396_v27 = vrot.slane %v395_v26, 2  ;;  %v542_v63 = vld [vmem:[%s1107_s9] sm:$0xff] }
  0x43   : > { %v523_v12 = vld [vmem:[%s355_s12] sm:$0xff] }
  0x44   : > { %v397_v28 = vadd.f32 %v396_v27, %v395_v26 }
  0x46   : > { %v398_v29 = vrot.slane %v397_v28, 1 }
  0x48   : > { %v399_v30 = vadd.f32 %v398_v29, %v397_v28 }
  0x4a   : > { %v400_v31 = vmax.f32 %v399_v30, 1e-24 }
  0x4e   : > { %488 = vperm.xlu0 %829, %v486_v18  }
  0xc5   : > { %v373_v20 = vpop.xlane.xlu0 %372 }
  0xc6   : > { %v374_v21 = vmax.f32 %v373_v20, 1e-24 }
  0xc8   : > { %831 = vrsqrt.f32 %v374_v21 }
  0xc9   : > { %833 = vrsqrt.f32 %v400_v31 }
  0xcd   : > { %v489_v37 = vpop.permute.xlu0 %488 }
  0xce   : > { %vm490_vm3 = vcmp.eq.s32.totalorder %v485_v36, %v489_v37 }
  0xd2   : > { %v832_v22 = vpop.eup %831 }
  0xd3   : > { %v376_v23 = vmul.f32 %v832_v22, %v368_v0  ;;  %v834_v35 = vpop.eup %833  ;;  %v521_v0 = vld [vmem:[%s351_s16] sm:$0xff] }
  0xd5   : > { %377 = vst.msk [vmem:[#allocation2] sm:$0xff] %vm370_vm0, %v376_v23 }
  0xdc   : > { %v402_v24 = vld [vmem:[#allocation2] sm:$0xff] }
  0xdd   : > { %758 = vmatmul.mubr.msk.f32.vlgmr.msra.gmra.mrb[0].mxu0 %vm370_vm0, %v402_v24 }
 0x1b0   : > { %v473_v38 = vpop.f32.mrb[0].mxu0 }
 0x1b1   : > { %v477_v39 = vmul.f32 %v834_v35, %v473_v38  ;;  %v759_v40 = vpop.f32.mrb[1].mxu0 }
 0x1b3   : > { %v739_v41 = vclamps-f32 %v477_v39, 0.99999 }
 0x1b5   : > { %v491_v42 = vsel %vm490_vm3, %v739_v41, 0.0 }
 0x1b6   : > { %492 = vadd.xlane.f32.xlu1 %v491_v42 }
 0x243   : > { %v493_v44 = vpop.xlane.xlu1 %492 }
 0x244   : > { %v494_v45 = vmul.f32 %v493_v44, %v493_v44  ;;  %v548_v46 = vadd.f32 %v547_v43, %v493_v44  ;;  %v504_v54 = vmul.f32 0.87758255, %v493_v44  ;;  %vm507_vm6 = vcmp.lt.f32.partialorder %v493_v44, -0.8775813 }
 0x246   : > { %v495_v47 = vsub.f32 1.0, %v494_v45  ;;  %549 = vst.msk [vmem:[%s1091_s23] sm:$0xff] %vm378_vm2, %v548_v46 }
 0x248   : > { %v496_v48 = vmax.f32 %v495_v47, 0.0 }
 0x24a   : > { %835 = vrsqrt.f32 %v496_v48  ;;  %vm499_vm4 = vcmp.eq.f32.partialorder %v496_v48, inf  ;;  %v502_v51 = vand.u32 2147483648, %v496_v48  ;;  %vm501_vm5 = vcmp.eq.f32.partialorder %v496_v48, 0.0 }
 0x254   : > { %v836_v49 = vpop.eup %835 }
 0x255   : > { %v498_v50 = vmul.f32 %v836_v49, %v496_v48 }
 0x257   : > { %v500_v52 = vsel %vm499_vm4, %v496_v48, %v498_v50 }
 0x258   : > { %v503_v53 = vsel %vm501_vm5, %v502_v51, %v500_v52 }
 0x259   : > { %v505_v55 = vmul.f32 0.47942555, %v503_v53 }
 0x25b   : > { %v506_v56 = vsub.f32 %v504_v54, %v505_v55 }
 0x25d   : > { %v508_v57 = vsel %vm507_vm6, -1.0, %v506_v56 }
 0x25e   : > { %v509_v58 = vsel %vm490_vm3, %v508_v57, %v739_v41 }
 0x25f   : > { %v510_v60 = vmul.f32 64.0, %v509_v58 }
 0x261   : > { %v518_v61 = vadd.f32 %v741_v59, %v510_v60 }
 0x263   : > { %543 = vadd.xlane.f32.xlu0 %v518_v61  ;;  %519 = vmax.xlane.f32.xlu1 %v518_v61 }
 0x2f0   : > { %v544_v1 = vpop.xlane.xlu0 %543  ;;  %v520_v2 = vpop.xlane.xlu1 %519 }
 0x2f1   : > { %v545_v3 = vadd.f32 %v544_v1, %v542_v63  ;;  %v522_v4 = vmax.f32 %v521_v0, %v520_v2 }
 0x2f3   : > { %546 = vst.msk [vmem:[%s1107_s9] sm:$0xff] %vm378_vm2, %v545_v3  ;;  %v524_v5 = vsub.f32 %v521_v0, %v522_v4  ;;  %541 = vst.msk [vmem:[%s351_s16] sm:$0xff] %vm378_vm2, %v522_v4  ;;  %530 = vperm.xlu1 %830, %v522_v4  }
 0x2f5   : > { %v525_v10 = vmul.f32 1.442695, %v524_v5 }
 0x372   : > { %v531_v6 = vpop.permute.xlu1 %530 }
 0x373   : > { %v533_v7 = vsub.f32 %v518_v61, %v531_v6 }
 0x375   : > { %v534_v8 = vmul.f32 1.442695, %v533_v7 }
 0x377   : > { %837 = vpow2.f32 %v534_v8 }
 0x378   : > { %839 = vpow2.f32 %v525_v10 }
 0x381   : > { %v838_v9 = vpop.eup %837 }
 0x382   : > { %536 = vadd.xlane.f32.xlu1 %v838_v9  ;;  %v840_v11 = vpop.eup %839 }
 0x383   : > { %v527_v13 = vmul.f32 %v840_v11, %v523_v12 }
 0x40f   : > { %v537_v14 = vpop.xlane.xlu1 %536 }
 0x410   : > { %v538_v15 = vadd.f32 %v537_v14, %v527_v13 }
 0x412   : > { %540 = vst.msk [vmem:[%s355_s12] sm:$0xff] %vm378_vm2, %v538_v15 }
 0x413 PF: > { %s21_s29 = sadd.s32 1, %s921_s29   ;;  %s1166_s24 = smov %s905_s25 }
 0x414   : > { %p18_p9 = scmp.ge.s32.totalorder %s21_s29, 4   ;;  %s1167_s25 = smov %s909_s26 }
 0x415   : > { %s1168_s26 = smov %s1021_s13  ;;  %s1169_s27 = smov %s917_s28 }
 0x416   : > { %s1170_s28 = smov %s1172_s8  ;;  %20 = sbr.rel (!%p18_p9) target bundleno = 4 (0x4), region = 119 }
 0x41d   :  { %611 = vsyncpa [#allocation4], 1 }
 0x41e   :  { %613 = vsyncpa [#allocation4 + $0x1], 1 }

</bundles_post_ra>
